<compile_context>
chip_gen: v6e
topology: v6e:2x2x1
jax: 0.10.0
libtpu: 0.0.40
codegen_flags: <defaults>
</compile_context>

<pallas_src>
import jax
import jax.numpy as jnp
from jax.experimental import pallas as pl
from jax.experimental.pallas import tpu as pltpu


def _round_up(x, m):
    return (x + m - 1) // m * m


def mlp_kernel(x_ref, w1_ref, b1_ref, w2_ref, b2_ref, w3_ref, b3_ref, o_ref):
    # fc1 + ReLU (dropout = identity in eval mode); bf16 MXU dot, f32 accumulate.
    h1 = jnp.dot(x_ref[...], w1_ref[...], preferred_element_type=jnp.float32)
    h1 = jnp.maximum(h1 + b1_ref[...], 0.0)

    # fc2 + ReLU (bias add / activation kept in f32 — v5e has no bf16 VPU).
    h2 = jnp.dot(h1.astype(w2_ref.dtype), w2_ref[...],
                 preferred_element_type=jnp.float32)
    h2 = jnp.maximum(h2 + b2_ref[...], 0.0)

    # fc3 (output_size == 1): VPU multiply + XLU lane reduction instead of an
    # N=1 MXU matmul; result packed lane-dense as (TB//128, 128) so the final
    # store is an unmasked full-width vst.
    tbd, lanes = o_ref.shape
    h2r = h2.reshape(tbd, lanes, h2.shape[-1])
    out = jnp.sum(h2r * w3_ref[...], axis=-1) + b3_ref[0]
    o_ref[...] = out.astype(o_ref.dtype)


def regression_mlp_forward(x, params, block_rows=1024):
    """Fused forward. x: (batch, in_features) f32 -> (batch, 1) f32."""
    w1, b1, w2, b2, w3, b3 = params
    batch, in_features = x.shape
    hidden1 = w1.shape[1]
    hidden2 = w2.shape[1]
    out_features = w3.shape[1]
    assert out_features == 1, "kernel specializes the output_size == 1 head"

    # Batch tile: multiple of 128 (so the packed output tile is (TB//128, 128));
    # if more than one grid step is needed, TB is a multiple of 1024 so the
    # output block's sublane dim (TB//128) is a multiple of 8.
    if batch <= block_rows:
        tb = _round_up(batch, 128)
    else:
        tb = _round_up(block_rows, 1024)
    batch_padded = _round_up(batch, tb)
    grid_n = batch_padded // tb

    # Pad the batch; cast matmul operands to bf16 (halves HBM traffic on x).
    x_pad = x if batch_padded == batch else jnp.pad(
        x, ((0, batch_padded - batch), (0, 0)))
    x_bf16 = x_pad.astype(jnp.bfloat16)
    w1_bf16 = w1.astype(jnp.bfloat16)
    w2_bf16 = w2.astype(jnp.bfloat16)
    w3_row = w3.reshape(1, hidden2).astype(jnp.float32)   # fc3 weights as a row
    b3_smem = b3.reshape(-1).astype(jnp.float32)           # scalar bias -> SMEM

    nbytes = lambda a: a.size * a.dtype.itemsize
    cost = pl.CostEstimate(
        flops=2 * batch_padded * (in_features * hidden1
                                  + hidden1 * hidden2 + hidden2),
        transcendentals=0,
        bytes_accessed=(nbytes(x_bf16) + nbytes(w1_bf16) + nbytes(b1)
                        + nbytes(w2_bf16) + nbytes(b2) + nbytes(w3_row)
                        + nbytes(b3_smem) + batch_padded * 4),
    )

    out_packed = pl.pallas_call(
        mlp_kernel,
        out_shape=jax.ShapeDtypeStruct((batch_padded // 128, 128), jnp.float32),
        grid=(grid_n,),
        in_specs=[
            pl.BlockSpec((tb, in_features), lambda i: (i, 0)),   # x: streamed
            pl.BlockSpec(w1_bf16.shape, lambda i: (0, 0)),       # weights & biases
            pl.BlockSpec(b1.shape, lambda i: (0, 0)),            #   stay VMEM-resident
            pl.BlockSpec(w2_bf16.shape, lambda i: (0, 0)),
            pl.BlockSpec(b2.shape, lambda i: (0, 0)),
            pl.BlockSpec(w3_row.shape, lambda i: (0, 0)),
            pl.BlockSpec(memory_space=pltpu.MemorySpace.SMEM),   # b3 scalar
        ],
        out_specs=pl.BlockSpec((tb // 128, 128), lambda i: (i, 0)),  # lane-dense
        compiler_params=pltpu.CompilerParams(
            dimension_semantics=("parallel",),     # v7x: shard batch over 2 TCs
            vmem_limit_bytes=32 * 1024 * 1024,     # fits v7x's smaller VMEM
        ),
        cost_estimate=cost,
    )(x_bf16, w1_bf16, b1, w2_bf16, b2, w3_row, b3_smem)

    # Unpack the lane-dense slab back to (batch, 1).
    return out_packed.reshape(batch_padded, 1)[:batch]


def reference_forward(x, params):
    """Plain-JAX reference with the same bf16 operand casts (eval-mode dropout)."""
    w1, b1, w2, b2, w3, b3 = params
    h1 = jnp.dot(x.astype(jnp.bfloat16), w1.astype(jnp.bfloat16),
                 preferred_element_type=jnp.float32)
    h1 = jnp.maximum(h1 + b1, 0.0)
    h2 = jnp.dot(h1.astype(jnp.bfloat16), w2.astype(jnp.bfloat16),
                 preferred_element_type=jnp.float32)
    h2 = jnp.maximum(h2 + b2, 0.0)
    return jnp.dot(h2, w3) + b3


def init_linear(key, in_f, out_f):
    """Deterministic nn.Linear-style init: U(-1/sqrt(in_f), 1/sqrt(in_f))."""
    kw, kb = jax.random.split(key)
    bound = 1.0 / jnp.sqrt(jnp.float32(in_f))
    w = jax.random.uniform(kw, (in_f, out_f), jnp.float32, -bound, bound)
    b = jax.random.uniform(kb, (1, out_f), jnp.float32, -bound, bound)
    return w, b


if __name__ == "__main__":
    key = jax.random.PRNGKey(0)
    k_x, k1, k2, k3 = jax.random.split(key, 4)

    input_size = 16          # stand-in for X_train.shape[1]
    hidden1, hidden2, out_size = 64, 32, 1

    w1, b1 = init_linear(k1, input_size, hidden1)
    w2, b2 = init_linear(k2, hidden1, hidden2)
    w3, b3 = init_linear(k3, hidden2, out_size)
    params = (w1, b1, w2, b2, w3, b3)

    # Small batch (single grid step) plus one that exercises padding and a
    # multi-step "parallel" grid.
    for batch in (8, 2051):
        x = jax.random.normal(k_x, (batch, input_size), jnp.float32)
        y = jax.block_until_ready(regression_mlp_forward(x, params))
        y_ref = reference_forward(x, params)
        assert y.shape == (batch, out_size)
        assert jnp.allclose(y, y_ref, atol=5e-3, rtol=5e-3), (
            "max abs err = %g" % float(jnp.max(jnp.abs(y - y_ref))))

    print("KERNEL_OK")
</pallas_src>

<mosaic_0001>
module attributes {stable_mosaic.version = 11 : i64} {
  func.func @mlp_kernel(%arg0: i32, %arg1: memref<128x16xbf16, #tpu.memory_space<vmem>>, %arg2: memref<16x64xbf16, #tpu.memory_space<vmem>>, %arg3: memref<1x64xf32, #tpu.memory_space<vmem>>, %arg4: memref<64x32xbf16, #tpu.memory_space<vmem>>, %arg5: memref<1x32xf32, #tpu.memory_space<vmem>>, %arg6: memref<1x32xf32, #tpu.memory_space<vmem>>, %arg7: memref<1xf32, #tpu.memory_space<smem>>, %arg8: memref<1x128xf32, #tpu.memory_space<vmem>>) attributes {dimension_semantics = [#tpu.dimension_semantics<parallel>], iteration_bounds = array<i64: 1>, scalar_prefetch = 0 : i64, scratch_operands = 0 : i64, tpu.core_type = #tpu.core_type<tc>, window_params = [{transform_indices = @transform_0, window_bounds = array<i64: 128, 16>}, {pipeline_mode = #tpu.pipeline_mode<synchronous>, transform_indices = @transform_1, window_bounds = array<i64: 16, 64>}, {pipeline_mode = #tpu.pipeline_mode<synchronous>, transform_indices = @transform_2, window_bounds = array<i64: 1, 64>}, {pipeline_mode = #tpu.pipeline_mode<synchronous>, transform_indices = @transform_3, window_bounds = array<i64: 64, 32>}, {pipeline_mode = #tpu.pipeline_mode<synchronous>, transform_indices = @transform_4, window_bounds = array<i64: 1, 32>}, {pipeline_mode = #tpu.pipeline_mode<synchronous>, transform_indices = @transform_5, window_bounds = array<i64: 1, 32>}, {transform_indices = @transform_6, window_bounds = array<i64: 1>}, {transform_indices = @transform_7, window_bounds = array<i64: 1, 128>}]} {
    %c0 = arith.constant 0 : index
    %c0_0 = arith.constant 0 : index
    %0 = vector.load %arg1[%c0, %c0_0] : memref<128x16xbf16, #tpu.memory_space<vmem>>, vector<128x16xbf16>
    %c0_1 = arith.constant 0 : index
    %c0_2 = arith.constant 0 : index
    %1 = vector.load %arg2[%c0_1, %c0_2] : memref<16x64xbf16, #tpu.memory_space<vmem>>, vector<16x64xbf16>
    %cst = arith.constant dense<0.000000e+00> : vector<128x64xf32>
    %2 = tpu.matmul %0, %1, %cst {dimension_numbers = #tpu.dot_dimension_numbers<[1], [0], [0], [1], [0, 0, 1, 1], [], []>} : vector<128x16xbf16>, vector<16x64xbf16>, vector<128x64xf32> -> vector<128x64xf32>
    %c0_3 = arith.constant 0 : index
    %c0_4 = arith.constant 0 : index
    %3 = vector.load %arg3[%c0_3, %c0_4] : memref<1x64xf32, #tpu.memory_space<vmem>>, vector<1x64xf32>
    %4 = vector.broadcast %3 : vector<1x64xf32> to vector<128x64xf32>
    %5 = arith.addf %2, %4 : vector<128x64xf32>
    %cst_5 = arith.constant 0.000000e+00 : f32
    %6 = vector.broadcast %cst_5 : f32 to vector<128x64xf32>
    %7 = arith.maximumf %5, %6 : vector<128x64xf32>
    %8 = arith.truncf %7 : vector<128x64xf32> to vector<128x64xbf16>
    %c0_6 = arith.constant 0 : index
    %c0_7 = arith.constant 0 : index
    %9 = vector.load %arg4[%c0_6, %c0_7] : memref<64x32xbf16, #tpu.memory_space<vmem>>, vector<64x32xbf16>
    %cst_8 = arith.constant dense<0.000000e+00> : vector<128x32xf32>
    %10 = tpu.matmul %8, %9, %cst_8 {dimension_numbers = #tpu.dot_dimension_numbers<[1], [0], [0], [1], [0, 0, 1, 1], [], []>} : vector<128x64xbf16>, vector<64x32xbf16>, vector<128x32xf32> -> vector<128x32xf32>
    %c0_9 = arith.constant 0 : index
    %c0_10 = arith.constant 0 : index
    %11 = vector.load %arg5[%c0_9, %c0_10] : memref<1x32xf32, #tpu.memory_space<vmem>>, vector<1x32xf32>
    %12 = vector.broadcast %11 : vector<1x32xf32> to vector<128x32xf32>
    %13 = arith.addf %10, %12 : vector<128x32xf32>
    %cst_11 = arith.constant 0.000000e+00 : f32
    %14 = vector.broadcast %cst_11 : f32 to vector<128x32xf32>
    %15 = arith.maximumf %13, %14 : vector<128x32xf32>
    %16 = vector.shape_cast %15 : vector<128x32xf32> to vector<1x128x32xf32>
    %c0_12 = arith.constant 0 : index
    %c0_13 = arith.constant 0 : index
    %17 = vector.load %arg6[%c0_12, %c0_13] : memref<1x32xf32, #tpu.memory_space<vmem>>, vector<1x32xf32>
    %18 = vector.shape_cast %17 : vector<1x32xf32> to vector<1x1x32xf32>
    %19 = vector.broadcast %18 : vector<1x1x32xf32> to vector<1x128x32xf32>
    %20 = arith.mulf %16, %19 : vector<1x128x32xf32>
    %cst_14 = arith.constant dense<0.000000e+00> : vector<1x128xf32>
    %21 = vector.multi_reduction <add>, %20, %cst_14 [2] : vector<1x128x32xf32> to vector<1x128xf32>
    %c0_15 = arith.constant 0 : index
    %22 = memref.load %arg7[%c0_15] : memref<1xf32, #tpu.memory_space<smem>>
    %23 = vector.broadcast %22 : f32 to vector<1x128xf32>
    %24 = arith.addf %21, %23 : vector<1x128xf32>
    %c0_16 = arith.constant 0 : index
    %c0_17 = arith.constant 0 : index
    %25 = vector.load %arg8[%c0_16, %c0_17] : memref<1x128xf32, #tpu.memory_space<vmem>>, vector<1x128xf32>
    tpu.vector_store %arg8[%c0_16, %c0_17], %24 {strides = array<i32>} : memref<1x128xf32, #tpu.memory_space<vmem>>, vector<1x128xf32>,
    return
  }
  func.func @transform_0(%arg0: i32) -> (i32, i32) {
    %c0_i32 = arith.constant 0 : i32
    %c0_i32_0 = arith.constant 0 : i32
    return %arg0, %c0_i32 : i32, i32
  }
  func.func @transform_1(%arg0: i32) -> (i32, i32) {
    %c0_i32 = arith.constant 0 : i32
    %c0_i32_0 = arith.constant 0 : i32
    %c0_i32_1 = arith.constant 0 : i32
    return %c0_i32, %c0_i32_0 : i32, i32
  }
  func.func @transform_2(%arg0: i32) -> (i32, i32) {
    %c0_i32 = arith.constant 0 : i32
    %c0_i32_0 = arith.constant 0 : i32
    %c0_i32_1 = arith.constant 0 : i32
    return %c0_i32, %c0_i32_0 : i32, i32
  }
  func.func @transform_3(%arg0: i32) -> (i32, i32) {
    %c0_i32 = arith.constant 0 : i32
    %c0_i32_0 = arith.constant 0 : i32
    %c0_i32_1 = arith.constant 0 : i32
    return %c0_i32, %c0_i32_0 : i32, i32
  }
  func.func @transform_4(%arg0: i32) -> (i32, i32) {
    %c0_i32 = arith.constant 0 : i32
    %c0_i32_0 = arith.constant 0 : i32
    %c0_i32_1 = arith.constant 0 : i32
    return %c0_i32, %c0_i32_0 : i32, i32
  }
  func.func @transform_5(%arg0: i32) -> (i32, i32) {
    %c0_i32 = arith.constant 0 : i32
    %c0_i32_0 = arith.constant 0 : i32
    %c0_i32_1 = arith.constant 0 : i32
    return %c0_i32, %c0_i32_0 : i32, i32
  }
  func.func @transform_6(%arg0: i32) -> i32 {
    %c0_i32 = arith.constant 0 : i32
    %c0_i32_0 = arith.constant 0 : i32
    return %c0_i32 : i32
  }
  func.func @transform_7(%arg0: i32) -> (i32, i32) {
    %c0_i32 = arith.constant 0 : i32
    %c0_i32_0 = arith.constant 0 : i32
    return %arg0, %c0_i32 : i32, i32
  }
}

</mosaic_0001>

<bundles_post_ra>
// kernel: tpu_custom_call.1
= control target key start
LH: loop header
LB: loop body
LE: loop exit
PB: predicated region body
PF: predicated region fallthrough
CT: control target
= control target key end

     0   :  { %vm100_vm0 = vcmask 130048   ;;  %s1004_s0 = inlined_call_operand.vmem [shape: bf16[128,16], index: 0, kind: input, shape index: {}]   ;;  %s1005_s1 = inlined_call_operand.vmem [shape: bf16[16,64], index: 1, kind: input, shape index: {}]   ;;  %s1006_s2 = inlined_call_operand.vmem [shape: f32[1,64], index: 2, kind: input, shape index: {}]   ;;  %s1007_s3 = inlined_call_operand.vmem [shape: bf16[64,32], index: 3, kind: input, shape index: {}]   ;;  %s1008_s4 = inlined_call_operand.vmem [shape: f32[1,32], index: 4, kind: input, shape index: {}]   ;;  %s1009_s5 = inlined_call_operand.vmem [shape: f32[1,32], index: 5, kind: input, shape index: {}]   ;;  %s1010_s6 = inlined_call_operand.<no memory space> [shape: f32[1], index: 6, kind: input, shape index: {}]   ;;  %s1011_s7 = inlined_call_operand.hbm [shape: f32[1,128], index: 7, kind: output, shape index: {}]  }
   0x1   :  { %v752_v0 = vld [vmem:[%s1005_s1] sm:$0xff]   ;;  %v754_v2 = vld [vmem:[%s1004_s0 + $0x8] sm:$0xff]   ;;  %v755_v3 = vld [vmem:[%s1004_s0 + $0x10] sm:$0xff]  }
   0x2   :  { %v753_v1 = vld [vmem:[%s1004_s0] sm:$0xff]   ;;  %709 = vmatprep.subr.bf16.mxu0 %v752_v0  ;;  %v756_v4 = vld [vmem:[%s1004_s0 + $0x18] sm:$0xff]  }
   0x3   :  { %710 = vmatpush3.bf16.msra.mxu0 %v752_v0  ;;  %711 = vmatprep.mubr.msk.bf16.mxu0 %vm100_vm0, %v753_v1  ;;  %v757_v5 = vld [vmem:[%s1004_s0 + $0x20] sm:$0xff]   ;;  %v761_v6 = vld [vmem:[%s1007_s3 + $0x18] sm:$0xff]  }
   0x4   :  { %727 = vmatprep.subr.bf16.mxu1 %v761_v6 }
   0x5   :  { %728 = vmatpush3.bf16.msra.mxu1 %v761_v6 }
   0x6   :  { %712 = vmatmul.mubr.msk.bf16.vlgmr.msra.gmra.mxu0 %vm100_vm0, %v754_v2 }
   0x7   :  { %715 = vmatprep.mubr.msk.bf16.mxu0 %vm100_vm0, %v755_v3 }
   0x8   :  { %13 = vsyncpa [#allocation4], 0  ;;  %v758_v7 = vld [vmem:[%s1004_s0 + $0x28] sm:$0xff]   ;;  %v759_v8 = vld [vmem:[%s1004_s0 + $0x30] sm:$0xff]   ;;  %vm285_vm1 = vcmask 523264   ;;  %vm446_vm2 = vcmask 261120  }
   0x9   :  { %v760_v9 = vld [vmem:[%s1004_s0 + $0x38] sm:$0xff]   ;;  %v762_v10 = vld [vmem:[%s1007_s3 + $0x10] sm:$0xff]   ;;  %v763_v11 = vld [vmem:[%s1007_s3 + $0x8] sm:$0xff]   ;;  %vm540_vm3 = vcmask 130112   ;;  %vm547_vm4 = vcmask 195712   ;;  %vm554_vm5 = vcmask 261312  }
   0xa   :  { %729 = vmatprep.subr.bf16.mxu1 %v762_v10  ;;  %v764_v12 = vld [vmem:[%s1007_s3] sm:$0xff]   ;;  %vm561_vm6 = vcmask 326912   ;;  %vm568_vm7 = vcmask 392512   ;;  %vm575_vm8 = vcmask 458112   ;;  %vm582_vm9 = vcmask 523712  }
   0xb   :  { %730 = vmatpush3.bf16.msra.mxu1 %v762_v10  ;;  %v656_v15 = vld [vmem:[%s1006_s2] ss:$0 sm:$0xff]  ;;  %vm589_vm10 = vcmask 589312   ;;  %vm596_vm11 = vcmask 654912   ;;  %vm603_vm12 = vcmask 720512   ;;  %vm610_vm13 = vcmask 786112  }
   0xc   :  { %731 = vmatprep.subr.bf16.mxu1 %v763_v11  ;;  %v889_v6 = vld [vmem:[%s1008_s4] ss:$0 sm:$0xff]  ;;  %vm617_vm14 = vcmask 851712   ;;  %vm624_vm15 = vcmask 917312  }
   0xd   :  { %v895_v10 = vld [vmem:[%s1009_s5] ss:$0 sm:$0xff] }
   0xe   :  { %716 = vmatmul.mubr.msk.bf16.gmra.mxu0 %vm100_vm0, %v756_v4 }
   0xf   :  { %719 = vmatprep.mubr.msk.bf16.mxu0 %vm100_vm0, %v757_v5  ;;  %732 = vmatpush3.bf16.msra.mxu1 %v763_v11 }
  0x10   :  { %733 = vmatprep.subr.bf16.mxu1 %v764_v12 }
  0x13   :  { %734 = vmatpush3.bf16.msra.mxu1 %v764_v12 }
  0x16   :  { %720 = vmatmul.mubr.msk.bf16.gmra.mxu0 %vm100_vm0, %v758_v7 }
  0x17   :  { %723 = vmatprep.mubr.msk.bf16.mxu0 %vm100_vm0, %v759_v8 }
  0x1e   :  { %724 = vmatmul.mubr.msk.bf16.gmra.mxu0 %vm100_vm0, %v760_v9  ;;  %vm631_vm0 = vcmask 982912  }
  0xc6   :  { %v713_v13 = vpop.f32.mrf.mxu0 }
  0xc7   :  { %v168_v19 = vadd.f32 %v713_v13, %v656_v15 }
  0xc8   :  { %v159_v14 = vpop.f32.mrf.mxu0 }
  0xc9   :  { %v160_v17 = vadd.f32 %v656_v15, %v159_v14  ;;  %v224_v26 = vmax.f32 %v168_v19, 0.0 }
  0xca   :  { %v714_v16 = vpop.f32.mrf.mxu0 }
  0xcb   :  { %v171_v18 = vadd.f32 %v714_v16, %v656_v15  ;;  %v222_v24 = vmax.f32 %v160_v17, 0.0 }
  0xcc   :  { %v162_v20 = vpop.f32.mrf.mxu0 }
  0xcd   :  { %v163_v21 = vadd.f32 %v656_v15, %v162_v20  ;;  %v225_v22 = vmax.f32 %v171_v18, 0.0 }
  0xce   :  { %v717_v23 = vpop.f32.mrf.mxu0 }
  0xcf   :  { %v223_v25 = vmax.f32 %v163_v21, 0.0  ;;  %v239_v29 = vpack.c.bf16 %v225_v22, %v224_v26  ;;  %v184_v33 = vadd.f32 %v717_v23, %v656_v15 }
  0xd0   :  { %v175_v27 = vpop.f32.mrf.mxu0 }
  0xd1   :  { %v238_v28 = vpack.c.bf16 %v223_v25, %v222_v24  ;;  %v176_v31 = vadd.f32 %v656_v15, %v175_v27  ;;  %v228_v40 = vmax.f32 %v184_v33, 0.0 }
  0xd2   :  { %v718_v30 = vpop.f32.mrf.mxu0 }
  0xd3   :  { %v187_v32 = vadd.f32 %v718_v30, %v656_v15  ;;  %735 = vmatprep.mubr.msk.bf16.mxu1 %vm285_vm1, %v238_v28  ;;  %v226_v38 = vmax.f32 %v176_v31, 0.0 }
  0xd4   :  { %v178_v34 = vpop.f32.mrf.mxu0  ;;  %736 = vmatmul.mubr.msk.bf16.vlgmr.msra.gmra.mxu1 %vm285_vm1, %v239_v29 }
  0xd5   :  { %v179_v35 = vadd.f32 %v656_v15, %v178_v34  ;;  %v229_v36 = vmax.f32 %v187_v32, 0.0 }
  0xd6   :  { %v721_v37 = vpop.f32.mrf.mxu0 }
  0xd7   :  { %v227_v39 = vmax.f32 %v179_v35, 0.0  ;;  %v241_v43 = vpack.c.bf16 %v229_v36, %v228_v40  ;;  %v200_v47 = vadd.f32 %v721_v37, %v656_v15 }
  0xd8   :  { %v191_v41 = vpop.f32.mrf.mxu0 }
  0xd9   :  { %v240_v42 = vpack.c.bf16 %v227_v39, %v226_v38  ;;  %v192_v45 = vadd.f32 %v656_v15, %v191_v41  ;;  %v232_v54 = vmax.f32 %v200_v47, 0.0 }
  0xda   :  { %v722_v44 = vpop.f32.mrf.mxu0 }
  0xdb   :  { %v203_v46 = vadd.f32 %v722_v44, %v656_v15  ;;  %739 = vmatprep.mubr.msk.bf16.mxu1 %vm285_vm1, %v240_v42  ;;  %v230_v52 = vmax.f32 %v192_v45, 0.0 }
  0xdc   :  { %v194_v48 = vpop.f32.mrf.mxu0  ;;  %740 = vmatmul.mubr.msk.bf16.gmra.mxu1 %vm285_vm1, %v241_v43 }
  0xdd   :  { %v195_v49 = vadd.f32 %v656_v15, %v194_v48  ;;  %v233_v50 = vmax.f32 %v203_v46, 0.0 }
  0xde   :  { %v725_v51 = vpop.f32.mrf.mxu0 }
  0xdf   :  { %v231_v53 = vmax.f32 %v195_v49, 0.0  ;;  %v243_v57 = vpack.c.bf16 %v233_v50, %v232_v54  ;;  %v216_v61 = vadd.f32 %v725_v51, %v656_v15 }
  0xe0   :  { %v207_v55 = vpop.f32.mrf.mxu0 }
  0xe1   :  { %v242_v56 = vpack.c.bf16 %v231_v53, %v230_v52  ;;  %v208_v59 = vadd.f32 %v656_v15, %v207_v55  ;;  %v236_v3 = vmax.f32 %v216_v61, 0.0 }
  0xe2   :  { %v726_v58 = vpop.f32.mrf.mxu0 }
  0xe3   :  { %v219_v60 = vadd.f32 %v726_v58, %v656_v15  ;;  %743 = vmatprep.mubr.msk.bf16.mxu1 %vm285_vm1, %v242_v56  ;;  %v234_v1 = vmax.f32 %v208_v59, 0.0 }
  0xe4   :  { %v210_v62 = vpop.f32.mrf.mxu0  ;;  %744 = vmatmul.mubr.msk.bf16.gmra.mxu1 %vm285_vm1, %v243_v57 }
  0xe5   :  { %v211_v63 = vadd.f32 %v656_v15, %v210_v62  ;;  %v237_v0 = vmax.f32 %v219_v60, 0.0 }
  0xe7   :  { %v235_v2 = vmax.f32 %v211_v63, 0.0  ;;  %v245_v5 = vpack.c.bf16 %v237_v0, %v236_v3 }
  0xe9   :  { %v244_v4 = vpack.c.bf16 %v235_v2, %v234_v1 }
  0xeb   :  { %747 = vmatprep.mubr.msk.bf16.mxu1 %vm285_vm1, %v244_v4 }
  0xec   :  { %748 = vmatmul.mubr.msk.bf16.gmra.mxu1 %vm285_vm1, %v245_v5  ;;  %vm638_vm1 = vcmask 1048512  }
 0x194   :  { %v737_v7 = vpop.f32.mrf.mxu1 }
 0x195   :  { %v353_v8 = vadd.f32 %v737_v7, %v889_v6 }
 0x196   :  { %v344_v9 = vpop.f32.mrf.mxu1 }
 0x197   :  { %v409_v11 = vmax.f32 %v353_v8, 0.0  ;;  %v345_v12 = vadd.f32 %v889_v6, %v344_v9 }
 0x198   :  { %v738_v13 = vpop.f32.mrf.mxu1 }
 0x199   :  { %v407_v14 = vmax.f32 %v345_v12, 0.0  ;;  %v356_v15 = vadd.f32 %v738_v13, %v889_v6  ;;  %v432_v16 = vmul.f32 %v895_v10, %v409_v11 }
 0x19a   :  { %v347_v17 = vpop.f32.mrf.mxu1 }
 0x19b   :  { %v410_v18 = vmax.f32 %v356_v15, 0.0  ;;  %v348_v19 = vadd.f32 %v889_v6, %v347_v17  ;;  %v453_v20 = vsel %vm446_vm2, %v432_v16, 0.0  ;;  %v430_v21 = vmul.f32 %v895_v10, %v407_v14 }
 0x19c   :  { %454 = vadd.xlane.f32.xlu1 %v453_v20  ;;  %v741_v22 = vpop.f32.mrf.mxu1 }
 0x19d   :  { %v408_v23 = vmax.f32 %v348_v19, 0.0  ;;  %v369_v24 = vadd.f32 %v741_v22, %v889_v6  ;;  %v447_v25 = vsel %vm446_vm2, %v430_v21, 0.0  ;;  %v433_v26 = vmul.f32 %v895_v10, %v410_v18 }
 0x19e   :  { %v360_v27 = vpop.f32.mrf.mxu1  ;;  %448 = vadd.xlane.f32.xlu0 %v447_v25  ;;  %v529_v25 = vlaneseq }
 0x19f   :  { %v413_v28 = vmax.f32 %v369_v24, 0.0  ;;  %v361_v29 = vadd.f32 %v889_v6, %v360_v27  ;;  %v456_v30 = vsel %vm446_vm2, %v433_v26, 0.0  ;;  %v431_v31 = vmul.f32 %v895_v10, %v408_v23 }
 0x1a0   :  { %457 = vadd.xlane.f32.xlu1 %v456_v30  ;;  %v742_v32 = vpop.f32.mrf.mxu1  ;;  %v944_v26 = vand.u32 127, %v529_v25  ;;  %v947_v30 = vshrl.u32 %v529_v25, 7 }
 0x1a1   :  { %v411_v33 = vmax.f32 %v361_v29, 0.0  ;;  %v372_v34 = vadd.f32 %v742_v32, %v889_v6  ;;  %v450_v35 = vsel %vm446_vm2, %v431_v31, 0.0  ;;  %v436_v36 = vmul.f32 %v895_v10, %v413_v28 }
 0x1a2   :  { %v363_v37 = vpop.f32.mrf.mxu1  ;;  %451 = vadd.xlane.f32.xlu0 %v450_v35  ;;  %v535_v27 = vadd.s32 4294967288, %v944_v26  ;;  %v542_v31 = vadd.s32 4294967280, %v944_v26 }
 0x1a3   :  { %v414_v38 = vmax.f32 %v372_v34, 0.0  ;;  %v364_v39 = vadd.f32 %v889_v6, %v363_v37  ;;  %v465_v41 = vsel %vm446_vm2, %v436_v36, 0.0  ;;  %v434_v45 = vmul.f32 %v895_v10, %v411_v33 }
 0x1a4   :  { %v745_v40 = vpop.f32.mrf.mxu1  ;;  %v538_v32 = vsub.s32 %v535_v27, %v947_v30  ;;  %v533_v33 = vsub.s32 %v944_v26, %v947_v30  ;;  %v549_v36 = vadd.s32 4294967272, %v944_v26 }
 0x1a5   :  { %v412_v42 = vmax.f32 %v364_v39, 0.0  ;;  %v385_v43 = vadd.f32 %v745_v40, %v889_v6  ;;  %v437_v44 = vmul.f32 %v895_v10, %v414_v38  ;;  %v459_v54 = vsel %vm446_vm2, %v434_v45, 0.0 }
 0x1a6   :  { %v376_v46 = vpop.f32.mrf.mxu1  ;;  %466 = vadd.xlane.f32.xlu0 %v465_v41  ;;  %v545_v38 = vsub.s32 %v542_v31, %v947_v30  ;;  %v552_v45 = vsub.s32 %v549_v36, %v947_v30 }
 0x1a7   :  { %v417_v47 = vmax.f32 %v385_v43, 0.0  ;;  %v377_v48 = vadd.f32 %v889_v6, %v376_v46  ;;  %v468_v49 = vsel %vm446_vm2, %v437_v44, 0.0  ;;  %v435_v50 = vmul.f32 %v895_v10, %v412_v42 }
 0x1a8   :  { %469 = vadd.xlane.f32.xlu1 %v468_v49  ;;  %v746_v51 = vpop.f32.mrf.mxu1  ;;  %v556_v42 = vadd.s32 4294967264, %v944_v26  ;;  %v563_v46 = vadd.s32 4294967256, %v944_v26  ;;  %v570_v49 = vadd.s32 4294967248, %v944_v26 }
 0x1a9   :  { %v415_v52 = vmax.f32 %v377_v48, 0.0  ;;  %v388_v53 = vadd.f32 %v746_v51, %v889_v6  ;;  %v440_v55 = vmul.f32 %v895_v10, %v417_v47  ;;  %v462_v59 = vsel %vm446_vm2, %v435_v50, 0.0 }
 0x1aa   :  { %v379_v56 = vpop.f32.mrf.mxu1  ;;  %460 = vadd.xlane.f32.xlu0 %v459_v54 }
 0x1ab   :  { %v418_v57 = vmax.f32 %v388_v53, 0.0  ;;  %v380_v58 = vadd.f32 %v889_v6, %v379_v56  ;;  %v477_v61 = vsel %vm446_vm2, %v440_v55, 0.0  ;;  %v438_v1 = vmul.f32 %v895_v10, %v415_v52 }
 0x1ac   :  { %v749_v60 = vpop.f32.mrf.mxu1  ;;  %463 = vadd.xlane.f32.xlu1 %v462_v59  ;;  %v559_v52 = vsub.s32 %v556_v42, %v947_v30  ;;  %v566_v56 = vsub.s32 %v563_v46, %v947_v30  ;;  %v577_v59 = vadd.s32 4294967240, %v944_v26  ;;  %v633_v42 = vadd.s32 4294967176, %v944_v26 }
 0x1ad   :  { %v416_v62 = vmax.f32 %v380_v58, 0.0  ;;  %v401_v63 = vadd.f32 %v749_v60, %v889_v6  ;;  %v441_v0 = vmul.f32 %v895_v10, %v418_v57  ;;  %v471_v12 = vsel %vm446_vm2, %v438_v1, 0.0 }
 0x1ae   :  { %v392_v2 = vpop.f32.mrf.mxu1  ;;  %478 = vadd.xlane.f32.xlu0 %v477_v61  ;;  %v573_v58 = vsub.s32 %v570_v49, %v947_v30 }
 0x1af   :  { %v393_v3 = vadd.f32 %v889_v6, %v392_v2  ;;  %v480_v4 = vsel %vm446_vm2, %v441_v0, 0.0  ;;  %v439_v5 = vmul.f32 %v895_v10, %v416_v62  ;;  %v421_v8 = vmax.f32 %v401_v63, 0.0 }
 0x1b0   :  { %v750_v7 = vpop.f32.mrf.mxu1  ;;  %481 = vadd.xlane.f32.xlu1 %v480_v4  ;;  %v584_v0 = vadd.s32 4294967232, %v944_v26  ;;  %v598_v2 = vadd.s32 4294967216, %v944_v26 }
 0x1b1   :  { %v419_v9 = vmax.f32 %v393_v3, 0.0  ;;  %v404_v11 = vadd.f32 %v750_v7, %v889_v6  ;;  %v474_v15 = vsel %vm446_vm2, %v439_v5, 0.0  ;;  %v444_v20 = vmul.f32 %v895_v10, %v421_v8 }
 0x1b2   :  { %v395_v13 = vpop.f32.mrf.mxu1  ;;  %472 = vadd.xlane.f32.xlu0 %v471_v12  ;;  %v591_v7 = vadd.s32 4294967224, %v944_v26  ;;  %v580_v8 = vsub.s32 %v577_v59, %v947_v30 }
 0x1b3   :  { %v396_v14 = vadd.f32 %v889_v6, %v395_v13  ;;  %v442_v16 = vmul.f32 %v895_v10, %v419_v9  ;;  %v422_v17 = vmax.f32 %v404_v11, 0.0  ;;  %v489_v23 = vsel %vm446_vm2, %v444_v20, 0.0 }
 0x1b4   :  { %475 = vadd.xlane.f32.xlu1 %v474_v15  ;;  %v605_v11 = vadd.s32 4294967208, %v944_v26  ;;  %v587_v15 = vsub.s32 %v584_v0, %v947_v30 }
 0x1b5   :  { %v420_v18 = vmax.f32 %v396_v14, 0.0  ;;  %v483_v19 = vsel %vm446_vm2, %v442_v16, 0.0  ;;  %v445_v6 = vmul.f32 %v895_v10, %v422_v17  ;;  %v601_v16 = vsub.s32 %v598_v2, %v947_v30 }
 0x1b6   :  { %484 = vadd.xlane.f32.xlu0 %v483_v19 }
 0x1b7   :  { %v443_v21 = vmul.f32 %v895_v10, %v420_v18  ;;  %v492_v24 = vsel %vm446_vm2, %v445_v6, 0.0  ;;  %v953_v10 = vstv %s1010_s6  ;;  %v612_v18 = vadd.s32 4294967200, %v944_v26  ;;  %s787_s6 = smov [#allocation3]  }
 0x1b8   :  { %v608_v6 = vsub.s32 %v605_v11, %v947_v30  ;;  %s648_s29 = sshll.u32 %s787_s6, 4  ;;  %s649_s29 = int_to_ptr.vmem [resolvable:$true] %s648_s29 }
 0x1b9   :  { %v486_v22 = vsel %vm446_vm2, %v443_v21, 0.0  ;;  %v594_v21 = vsub.s32 %v591_v7, %v947_v30  ;;  %s765_s30 = scalar_lea.vmem %s649_s29, 16  ;;  %s769_s8 = scalar_lea.vmem %s649_s29, 32 }
 0x1ba   :  { %487 = vadd.xlane.f32.xlu1 %v486_v22  ;;  %490 = vadd.xlane.f32.xlu0 %v489_v23  ;;  %p766_p0 = scmp.ne.s32.totalorder %s649_s29, %s765_s30  ;;  %p770_p1 = scmp.lt.s32.totalorder %s649_s29, %s649_s29 }
 0x1bb   :  { %p771_p2 = scmp.lt.s32.totalorder %s769_s8, %s765_s30 }
 0x1bd   :  { %p772_p3 = por %p771_p2, %p770_p1 }
 0x1be   :  { %493 = vadd.xlane.f32.xlu1 %v492_v24 }
 0x1bf   :  { %p773_p4 = pnand %p772_p3, %p766_p0 }
 0x225   :  { %v455_v28 = vpop.xlane.xlu1 %454 }
 0x226   :  { %v499_v40 = vadd.f32 %v953_v10, %v455_v28 }
 0x227   :  { %v449_v29 = vpop.xlane.xlu0 %448 }
 0x228   :  { %v497_v34 = vadd.f32 %v953_v10, %v449_v29  ;;  %v546_v51 = vrot.slane %v499_v40, %v545_v38  ;;  %v619_v29 = vadd.s32 4294967192, %v944_v26 }
 0x229   :  { %v458_v39 = vpop.xlane.xlu1 %457 }
 0x22a   :  { %v534_v43 = vrot.slane %v497_v34, %v533_v33  ;;  %v500_v47 = vadd.f32 %v953_v10, %v458_v39  ;;  %v626_v34 = vadd.s32 4294967184, %v944_v26 }
 0x22b   :  { %v452_v35 = vpop.xlane.xlu0 %451 }
 0x22c   :  { %v498_v37 = vadd.f32 %v953_v10, %v452_v35  ;;  %v553_v57 = vrot.slane %v500_v47, %v552_v45  ;;  %v629_v46 = vsub.s32 %v626_v34, %v947_v30 }
 0x22e   :  { %v539_v41 = vrot.slane %v498_v37, %v538_v32  ;;  %v615_v32 = vsub.s32 %v612_v18, %v947_v30 }
 0x22f   :  { %v467_v44 = vpop.xlane.xlu0 %466 }
 0x230   :  { %v541_v48 = vsel %vm540_vm3, %v539_v41, %v534_v43  ;;  %v503_v61 = vadd.f32 %v953_v10, %v467_v44  ;;  %v622_v41 = vsub.s32 %v619_v29, %v947_v30 }
 0x231   :  { %v470_v50 = vpop.xlane.xlu1 %469  ;;  %v548_v54 = vsel %vm547_vm4, %v546_v51, %v541_v48 }
 0x232   :  { %v555_v1 = vsel %vm554_vm5, %v553_v57, %v548_v54  ;;  %v504_v9 = vadd.f32 %v953_v10, %v470_v50  ;;  %v574_v13 = vrot.slane %v503_v61, %v573_v58 }
 0x233   :  { %v461_v53 = vpop.xlane.xlu0 %460 }
 0x234   :  { %v501_v55 = vadd.f32 %v953_v10, %v461_v53  ;;  %v581_v22 = vrot.slane %v504_v9, %v580_v8 }
 0x235   :  { %v464_v60 = vpop.xlane.xlu1 %463 }
 0x236   :  { %v560_v62 = vrot.slane %v501_v55, %v559_v52  ;;  %v502_v63 = vadd.f32 %v953_v10, %v464_v60  ;;  %v636_v52 = vsub.s32 %v633_v42, %v947_v30 }
 0x237   :  { %v479_v3 = vpop.xlane.xlu0 %478 }
 0x238   :  { %v562_v4 = vsel %vm561_vm6, %v560_v62, %v555_v1  ;;  %v567_v5 = vrot.slane %v502_v63, %v566_v56  ;;  %v507_v23 = vadd.f32 %v953_v10, %v479_v3 }
 0x239   :  { %v482_v12 = vpop.xlane.xlu1 %481 }
 0x23a   :  { %v569_v14 = vsel %vm568_vm7, %v567_v5, %v562_v4  ;;  %v508_v25 = vadd.f32 %v953_v10, %v482_v12  ;;  %v602_v38 = vrot.slane %v507_v23, %v601_v16 }
 0x23b   :  { %v473_v17 = vpop.xlane.xlu0 %472  ;;  %v576_v19 = vsel %vm575_vm8, %v574_v13, %v569_v14 }
 0x23c   :  { %v505_v20 = vadd.f32 %v953_v10, %v473_v17  ;;  %v583_v31 = vsel %vm582_vm9, %v581_v22, %v576_v19  ;;  %v609_v39 = vrot.slane %v508_v25, %v608_v6 }
 0x23d   :  { %v476_v24 = vpop.xlane.xlu1 %475 }
 0x23e   :  { %v588_v27 = vrot.slane %v505_v20, %v587_v15  ;;  %v506_v28 = vadd.f32 %v953_v10, %v476_v24 }
 0x23f   :  { %v485_v33 = vpop.xlane.xlu0 %484 }
 0x240   :  { %v590_v35 = vsel %vm589_vm10, %v588_v27, %v583_v31  ;;  %v595_v36 = vrot.slane %v506_v28, %v594_v21  ;;  %v509_v37 = vadd.f32 %v953_v10, %v485_v33 }
 0x242   :  { %v597_v40 = vsel %vm596_vm11, %v595_v36, %v590_v35  ;;  %v616_v44 = vrot.slane %v509_v37, %v615_v32 }
 0x243   :  { %v604_v43 = vsel %vm603_vm12, %v602_v38, %v597_v40  ;;  %v488_v45 = vpop.xlane.xlu1 %487  ;;  %v491_v47 = vpop.xlane.xlu0 %490 }
 0x244   :  { %v611_v48 = vsel %vm610_vm13, %v609_v39, %v604_v43  ;;  %v510_v49 = vadd.f32 %v953_v10, %v488_v45  ;;  %v511_v50 = vadd.f32 %v953_v10, %v491_v47 }
 0x245   :  { %v618_v53 = vsel %vm617_vm14, %v616_v44, %v611_v48 }
 0x246   :  { %v623_v51 = vrot.slane %v510_v49, %v622_v41  ;;  %v630_v54 = vrot.slane %v511_v50, %v629_v46 }
 0x247   :  { %v494_v55 = vpop.xlane.xlu1 %493 }
 0x248   :  { %v512_v26 = vadd.f32 %v953_v10, %v494_v55  ;;  %v625_v56 = vsel %vm624_vm15, %v623_v51, %v618_v53 }
 0x249   :  { %v632_v58 = vsel %vm631_vm0, %v630_v54, %v625_v56 }
 0x24a   :  { %v637_v57 = vrot.slane %v512_v26, %v636_v52 }
 0x24c   :  { %v639_v59 = vsel %vm638_vm1, %v637_v57, %v632_v58 }
 0x24d   :  { %641 = vst [vmem:[#allocation3] sm:$0x1] %v639_v59 }
 0x24e   :  { %776 = shalt.err (!%p773_p4)
}
 0x24f   :  { %651 = dma.vmem_to_hbm [thread:$0]  %s649_s29, 16, %s1011_s7, [#allocation4]  }
 0x250   :  { %785 = dma.done.wait [#allocation4], 16  }
 0x251   :  { %786 = vsyncadd [#allocation4], 4294967280 }
 0x252   :  { %655 = vsyncpa [#allocation4], 1 }

</bundles_post_ra>
